<compile_context>
chip_gen: v5e
topology: v5e:2x2
jax: 0.10.0
libtpu: 0.0.40
codegen_flags: <defaults>
</compile_context>

<pallas_src>
import jax
import jax.numpy as jnp
import numpy as np
from jax.experimental import pallas as pl
from jax.experimental.pallas import tpu as pltpu


_VMEM = pl.BlockSpec(memory_space=pltpu.MemorySpace.VMEM)


# ----------------------------- kernel math -----------------------------------

def _lstm_gate_math(gates, c):
    """Elementwise LSTM gate math in f32.  gates:(B,4H), c:(B,H).

    Two full-vreg transcendental passes (sigmoid over all gates, tanh over all
    gates) then static lane slices; PyTorch gate order [i | f | g | o].
    Combined bias b_ih + b_hh == 0 under the reference init, so it is folded
    out.  # TODO(synk): re-introduce the bias add if params are ever trained/loaded.
    """
    H = c.shape[-1]
    sig = jax.nn.sigmoid(gates)   # one EUP pass over the whole (B, 4H) tile
    tnh = jnp.tanh(gates)         # one EUP pass over the whole (B, 4H) tile
    i_g = sig[:, 0 * H:1 * H]
    f_g = sig[:, 1 * H:2 * H]
    g_g = tnh[:, 2 * H:3 * H]
    o_g = sig[:, 3 * H:4 * H]
    c_new = f_g * c + i_g * g_g
    h_new = o_g * jnp.tanh(c_new)
    return h_new, c_new


# ----------------------------- Pallas kernels --------------------------------

def _lstm_step_kernel(x_ref, h_ref, c_ref, w_ih_ref, w_hh_ref,
                      h_out_ref, c_out_ref):
    """Single LSTM step (seq_len == 1), matches the module forward exactly."""
    gates = (jnp.dot(x_ref[...].astype(jnp.bfloat16), w_ih_ref[...],
                     preferred_element_type=jnp.float32)
             + jnp.dot(h_ref[...].astype(jnp.bfloat16), w_hh_ref[...],
                       preferred_element_type=jnp.float32))
    h_new, c_new = _lstm_gate_math(gates, c_ref[...])
    h_out_ref[...] = h_new.astype(h_out_ref.dtype)
    c_out_ref[...] = c_new.astype(c_out_ref.dtype)


def _lstm_seq_kernel(xs_ref, h0_ref, c0_ref, w_ih_ref, w_hh_ref,
                     hseq_ref, cT_ref):
    """T-step LSTM rollout in ONE kernel invocation (no grid).

    Prologue: hoisted input projection, one (T*B, V) @ (V, 4H) MXU matmul.
    Body: fully-unrolled recurrence with only the (B,H) @ (H,4H) matmul inside.
    Outputs: lane-resident (T,B,H) h sequence (single writeback) + final c.
    """
    T, B, V = xs_ref.shape
    H = h0_ref.shape[-1]

    # B == 8 keeps the (T,B,V) -> (T*B,V) reshape a pure sublane concatenation.
    x_all = xs_ref[...].reshape(T * B, V).astype(jnp.bfloat16)
    xproj = jnp.dot(x_all, w_ih_ref[...],
                    preferred_element_type=jnp.float32).reshape(T, B, 4 * H)

    w_hh = w_hh_ref[...]
    h = h0_ref[...]
    c = c0_ref[...]

    # T is small and static: fully unrolled, static indices everywhere.
    for t in range(T):
        gates = xproj[t] + jnp.dot(h.astype(jnp.bfloat16), w_hh,
                                   preferred_element_type=jnp.float32)
        h, c = _lstm_gate_math(gates, c)
        hseq_ref[t, :, :] = h.astype(hseq_ref.dtype)

    cT_ref[...] = c.astype(cT_ref.dtype)


def _ff_kernel(x_ref, w1_ref, b1_ref, w2_ref, b2_ref, out_ref):
    """FeedForwardController forward: relu(relu(x@W1+b1)@W2+b2)."""
    h1 = jnp.dot(x_ref[...].astype(jnp.bfloat16), w1_ref[...],
                 preferred_element_type=jnp.float32) + b1_ref[...]
    h1 = jnp.maximum(h1, 0.0)
    h2 = jnp.dot(h1.astype(jnp.bfloat16), w2_ref[...],
                 preferred_element_type=jnp.float32) + b2_ref[...]
    out_ref[...] = jnp.maximum(h2, 0.0).astype(out_ref.dtype)


# ----------------------------- wrappers (glue) --------------------------------

class FeedForwardController:
    def __init__(self, vector_length, hidden_size, key):
        stdev = 5.0 / np.sqrt(vector_length + hidden_size)
        k1, k2, k3, k4 = jax.random.split(key, 4)
        # weights stored as (in, out) == PyTorch weight.T; bf16 copies feed the MXU
        self.w1 = jax.random.uniform(k1, (vector_length, hidden_size),
                                     minval=-stdev, maxval=stdev,
                                     dtype=jnp.float32).astype(jnp.bfloat16)
        self.w2 = jax.random.uniform(k2, (hidden_size, hidden_size),
                                     minval=-stdev, maxval=stdev,
                                     dtype=jnp.float32).astype(jnp.bfloat16)
        # PyTorch nn.Linear default bias init (uniform +-1/sqrt(fan_in)), kept f32
        b1_bound = 1.0 / np.sqrt(vector_length)
        b2_bound = 1.0 / np.sqrt(hidden_size)
        self.b1 = jax.random.uniform(k3, (1, hidden_size),
                                     minval=-b1_bound, maxval=b1_bound,
                                     dtype=jnp.float32)
        self.b2 = jax.random.uniform(k4, (1, hidden_size),
                                     minval=-b2_bound, maxval=b2_bound,
                                     dtype=jnp.float32)
        self.vector_length = vector_length
        self.hidden_size = hidden_size

    def __call__(self, x, state):
        B = x.shape[0]
        V, H = self.vector_length, self.hidden_size
        cost = pl.CostEstimate(
            flops=2 * B * V * H + 2 * B * H * H + 4 * B * H,
            transcendentals=0,
            bytes_accessed=4 * B * V + 2 * (V * H + H * H) + 8 * H + 4 * B * H,
        )
        # TODO(synk): at these shapes this call is pure dispatch overhead; fuse
        # into the consuming NTM step kernel when that kernel exists.
        out = pl.pallas_call(
            _ff_kernel,
            out_shape=jax.ShapeDtypeStruct((B, H), jnp.float32),
            in_specs=[_VMEM] * 5,
            out_specs=_VMEM,
            cost_estimate=cost,
        )(x, self.w1, self.b1, self.w2, self.b2)
        return out, state

    def get_initial_state(self, batch_size=None):
        return (0, 0)


class LSTMController:
    def __init__(self, vector_length, hidden_size, key):
        stdev = 5.0 / np.sqrt(vector_length + hidden_size)
        k1, k2, k3, k4 = jax.random.split(key, 4)
        # PyTorch weight_ih_l0 / weight_hh_l0 (transposed), gate order [i|f|g|o];
        # kept as SEPARATE operands so the input projection can be hoisted.
        self.w_ih = jax.random.uniform(k1, (vector_length, 4 * hidden_size),
                                       minval=-stdev, maxval=stdev,
                                       dtype=jnp.float32).astype(jnp.bfloat16)
        self.w_hh = jax.random.uniform(k2, (hidden_size, 4 * hidden_size),
                                       minval=-stdev, maxval=stdev,
                                       dtype=jnp.float32).astype(jnp.bfloat16)
        # 1-D params are constant-init 0 in the reference -> bias folded out.
        # learned initial states, randn * 0.05, shape (1, 1, H)
        self.lstm_h_state = jax.random.normal(k3, (1, 1, hidden_size), jnp.float32) * 0.05
        self.lstm_c_state = jax.random.normal(k4, (1, 1, hidden_size), jnp.float32) * 0.05
        self.vector_length = vector_length
        self.hidden_size = hidden_size

    def _cost(self, batch, steps):
        V, H = self.vector_length, self.hidden_size
        flops = (2 * steps * batch * V * 4 * H        # hoisted input projection
                 + steps * 2 * batch * H * 4 * H      # recurrent matmul
                 + steps * 10 * batch * H)            # gate elementwise
        transcendentals = steps * 9 * batch * H       # 2 full-gate passes + tanh(c)
        bytes_accessed = (steps * batch * (V + H) * 4          # x in, h out
                          + (V + H) * 4 * H * 2                # bf16 weights
                          + 4 * batch * H * 4)                 # h/c in+out
        return pl.CostEstimate(flops=flops, transcendentals=transcendentals,
                               bytes_accessed=bytes_accessed)

    def __call__(self, x, state):
        # x: (B, V); state: (h, c) each (1, B, H)  (PyTorch LSTM convention)
        h, c = state
        B = x.shape[0]
        H = self.hidden_size
        h2d = h.reshape(B, H)
        c2d = c.reshape(B, H)
        h_new, c_new = pl.pallas_call(
            _lstm_step_kernel,
            out_shape=(
                jax.ShapeDtypeStruct((B, H), jnp.float32),
                jax.ShapeDtypeStruct((B, H), jnp.float32),
            ),
            in_specs=[_VMEM] * 5,
            out_specs=(_VMEM, _VMEM),
            cost_estimate=self._cost(B, 1),
        )(x, h2d, c2d, self.w_ih, self.w_hh)
        new_state = (h_new.reshape(1, B, H), c_new.reshape(1, B, H))
        return h_new, new_state

    def forward_sequence(self, xs, state):
        """Run T LSTM steps in a single grid-less pallas_call.

        xs: (T, B, V); state: (h, c) each (1, B, H).
        Returns (outputs (T, B, H), (hT, cT) each (1, B, H)).
        """
        T, B, V = xs.shape
        H = self.hidden_size
        h, c = state
        h2d = h.reshape(B, H)
        c2d = c.reshape(B, H)

        outs, cT = pl.pallas_call(
            _lstm_seq_kernel,
            out_shape=(
                jax.ShapeDtypeStruct((T, B, H), jnp.float32),
                jax.ShapeDtypeStruct((B, H), jnp.float32),
            ),
            in_specs=[_VMEM] * 5,
            out_specs=(_VMEM, _VMEM),
            cost_estimate=self._cost(B, T),
        )(xs, h2d, c2d, self.w_ih, self.w_hh)
        hT = outs[T - 1]                      # final hidden == last output row
        return outs, (hT.reshape(1, B, H), cT.reshape(1, B, H))

    def get_initial_state(self, batch_size):
        lstm_h = jnp.tile(self.lstm_h_state, (1, batch_size, 1))
        lstm_c = jnp.tile(self.lstm_c_state, (1, batch_size, 1))
        return (lstm_h, lstm_c)


class Controller:
    def __init__(self, lstm_controller, vector_length, hidden_size, key):
        self._lstm_controller = lstm_controller
        if lstm_controller:
            self._controller = LSTMController(vector_length, hidden_size, key)
        else:
            self._controller = FeedForwardController(vector_length, hidden_size, key)

    def __call__(self, x, state):
        return self._controller(x, state)

    def forward_sequence(self, xs, state):
        return self._controller.forward_sequence(xs, state)

    def get_initial_state(self, batch_size):
        return self._controller.get_initial_state(batch_size)


# ----------------------------------- main -------------------------------------

if __name__ == "__main__":
    key = jax.random.PRNGKey(0)
    k_lstm, k_ff, k_x, k_seq = jax.random.split(key, 4)

    batch = 8
    vector_length = 32
    hidden_size = 32
    seq_len = 6

    x = jax.random.normal(k_x, (batch, vector_length), jnp.float32)

    # ---- LSTM variant: single step (matches the module's forward) ----
    lstm_ctrl = Controller(True, vector_length, hidden_size, k_lstm)
    state0 = lstm_ctrl.get_initial_state(batch)
    out_step, (h1, c1) = lstm_ctrl(x, state0)
    jax.block_until_ready((out_step, h1, c1))
    assert out_step.shape == (batch, hidden_size)
    assert h1.shape == (1, batch, hidden_size) and c1.shape == (1, batch, hidden_size)
    assert bool(jnp.all(jnp.isfinite(out_step)))

    # ---- LSTM variant: fused multi-step kernel vs repeated single steps ----
    xs = jax.random.normal(k_seq, (seq_len, batch, vector_length), jnp.float32)
    seq_out, (hT, cT) = lstm_ctrl.forward_sequence(xs, state0)
    jax.block_until_ready((seq_out, hT, cT))
    assert seq_out.shape == (seq_len, batch, hidden_size)

    state = state0
    step_outs = []
    for t in range(seq_len):
        o, state = lstm_ctrl(xs[t], state)
        step_outs.append(o)
    step_outs = jnp.stack(step_outs, axis=0)
    assert bool(jnp.allclose(seq_out, step_outs, atol=1e-3, rtol=1e-3))
    assert bool(jnp.allclose(hT, state[0], atol=1e-3, rtol=1e-3))
    assert bool(jnp.allclose(cT, state[1], atol=1e-3, rtol=1e-3))

    # ---- FeedForward variant ----
    ff_ctrl = Controller(False, vector_length, hidden_size, k_ff)
    out_ff, _ = ff_ctrl(x, ff_ctrl.get_initial_state(batch))
    jax.block_until_ready(out_ff)
    assert out_ff.shape == (batch, hidden_size)
    assert bool(jnp.all(out_ff >= 0.0))  # ReLU output

    print("KERNEL_OK")
</pallas_src>

<mosaic_0001>
module attributes {stable_mosaic.version = 11 : i64} {
  func.func @_lstm_step_kernel(%arg0: memref<8x32xf32, #tpu.memory_space<vmem>>, %arg1: memref<8x32xf32, #tpu.memory_space<vmem>>, %arg2: memref<8x32xf32, #tpu.memory_space<vmem>>, %arg3: memref<32x128xbf16, #tpu.memory_space<vmem>>, %arg4: memref<32x128xbf16, #tpu.memory_space<vmem>>, %arg5: memref<8x32xf32, #tpu.memory_space<vmem>>, %arg6: memref<8x32xf32, #tpu.memory_space<vmem>>) attributes {dimension_semantics = [], scalar_prefetch = 0 : i64, scratch_operands = 0 : i64, tpu.core_type = #tpu.core_type<tc>} {
    %c0 = arith.constant 0 : index
    %c0_0 = arith.constant 0 : index
    %0 = vector.load %arg0[%c0, %c0_0] : memref<8x32xf32, #tpu.memory_space<vmem>>, vector<8x32xf32>
    %1 = arith.truncf %0 : vector<8x32xf32> to vector<8x32xbf16>
    %c0_1 = arith.constant 0 : index
    %c0_2 = arith.constant 0 : index
    %2 = vector.load %arg3[%c0_1, %c0_2] : memref<32x128xbf16, #tpu.memory_space<vmem>>, vector<32x128xbf16>
    %cst = arith.constant dense<0.000000e+00> : vector<8x128xf32>
    %3 = tpu.matmul %1, %2, %cst {dimension_numbers = #tpu.dot_dimension_numbers<[1], [0], [0], [1], [0, 0, 1, 1], [], []>} : vector<8x32xbf16>, vector<32x128xbf16>, vector<8x128xf32> -> vector<8x128xf32>
    %c0_3 = arith.constant 0 : index
    %c0_4 = arith.constant 0 : index
    %4 = vector.load %arg1[%c0_3, %c0_4] : memref<8x32xf32, #tpu.memory_space<vmem>>, vector<8x32xf32>
    %5 = arith.truncf %4 : vector<8x32xf32> to vector<8x32xbf16>
    %c0_5 = arith.constant 0 : index
    %c0_6 = arith.constant 0 : index
    %6 = vector.load %arg4[%c0_5, %c0_6] : memref<32x128xbf16, #tpu.memory_space<vmem>>, vector<32x128xbf16>
    %cst_7 = arith.constant dense<0.000000e+00> : vector<8x128xf32>
    %7 = tpu.matmul %5, %6, %cst_7 {dimension_numbers = #tpu.dot_dimension_numbers<[1], [0], [0], [1], [0, 0, 1, 1], [], []>} : vector<8x32xbf16>, vector<32x128xbf16>, vector<8x128xf32> -> vector<8x128xf32>
    %8 = arith.addf %3, %7 : vector<8x128xf32>
    %c0_8 = arith.constant 0 : index
    %c0_9 = arith.constant 0 : index
    %9 = vector.load %arg2[%c0_8, %c0_9] : memref<8x32xf32, #tpu.memory_space<vmem>>, vector<8x32xf32>
    %10 = arith.negf %8 : vector<8x128xf32>
    %11 = math.exp %10 : vector<8x128xf32>
    %cst_10 = arith.constant 1.000000e+00 : f32
    %12 = vector.broadcast %cst_10 : f32 to vector<8x128xf32>
    %13 = arith.addf %12, %11 : vector<8x128xf32>
    %14 = arith.divf %12, %13 : vector<8x128xf32>
    %15 = math.tanh %8 : vector<8x128xf32>
    %16 = vector.extract_strided_slice %14 {offsets = [0, 0], sizes = [8, 32], strides = [1, 1]} : vector<8x128xf32> to vector<8x32xf32>
    %17 = vector.extract_strided_slice %14 {offsets = [0, 32], sizes = [8, 32], strides = [1, 1]} : vector<8x128xf32> to vector<8x32xf32>
    %18 = vector.extract_strided_slice %15 {offsets = [0, 64], sizes = [8, 32], strides = [1, 1]} : vector<8x128xf32> to vector<8x32xf32>
    %19 = vector.extract_strided_slice %14 {offsets = [0, 96], sizes = [8, 32], strides = [1, 1]} : vector<8x128xf32> to vector<8x32xf32>
    %20 = arith.mulf %17, %9 : vector<8x32xf32>
    %21 = arith.mulf %16, %18 : vector<8x32xf32>
    %22 = arith.addf %20, %21 : vector<8x32xf32>
    %23 = math.tanh %22 : vector<8x32xf32>
    %24 = arith.mulf %19, %23 : vector<8x32xf32>
    %c0_11 = arith.constant 0 : index
    %c0_12 = arith.constant 0 : index
    %25 = vector.load %arg5[%c0_11, %c0_12] : memref<8x32xf32, #tpu.memory_space<vmem>>, vector<8x32xf32>
    tpu.vector_store %arg5[%c0_11, %c0_12], %24 {strides = array<i32>} : memref<8x32xf32, #tpu.memory_space<vmem>>, vector<8x32xf32>,
    %c0_13 = arith.constant 0 : index
    %c0_14 = arith.constant 0 : index
    %26 = vector.load %arg6[%c0_13, %c0_14] : memref<8x32xf32, #tpu.memory_space<vmem>>, vector<8x32xf32>
    tpu.vector_store %arg6[%c0_13, %c0_14], %22 {strides = array<i32>} : memref<8x32xf32, #tpu.memory_space<vmem>>, vector<8x32xf32>,
    return
  }
}

</mosaic_0001>

<bundles_post_ra>
// kernel: tpu_custom_call.1
= control target key start
LH: loop header
LB: loop body
LE: loop exit
PB: predicated region body
PF: predicated region fallthrough
CT: control target
= control target key end

     0   :  { %12 = vsyncpa [#allocation3], 0  ;;  %s553_s0 = inlined_call_operand.hbm [shape: f32[8,32], index: 0, kind: input, shape index: {}]   ;;  %s554_s1 = inlined_call_operand.hbm [shape: f32[8,32], index: 1, kind: input, shape index: {}]   ;;  %s555_s2 = inlined_call_operand.hbm [shape: f32[8,32], index: 2, kind: input, shape index: {}]   ;;  %s556_s3 = inlined_call_operand.hbm [shape: bf16[32,128], index: 3, kind: input, shape index: {}]   ;;  %s557_s4 = inlined_call_operand.hbm [shape: bf16[32,128], index: 4, kind: input, shape index: {}]   ;;  %s558_s5 = inlined_call_operand.hbm [shape: f32[8,32], index: 5, kind: output, shape index: {0}]   ;;  %s559_s6 = inlined_call_operand.hbm [shape: f32[8,32], index: 6, kind: output, shape index: {1}]  }
   0x1   :  { %13 = vsyncpa [#allocation6], 0 }
   0x2   :  { %14 = vsyncpa [#allocation9], 0 }
   0x3   :  { %15 = vsyncpa [#allocation4], 0  ;;  %s33_s23 = sshll.u32 %s554_s1, 4  ;;  %s34_s23 = int_to_ptr.hbm [resolvable:$true] %s33_s23 }
   0x4   :  { %16 = vsyncpa [#allocation13], 0  ;;  %s473_s24 = smov [#allocation5]   ;;  %s54_s28 = sshll.u32 %s556_s3, 4  ;;  %s55_s28 = int_to_ptr.hbm [resolvable:$true] %s54_s28 }
   0x5   :  { %s35_s25 = sshll.u32 %s473_s24, 4  ;;  %s474_s29 = smov [#allocation8]   ;;  %s36_s25 = int_to_ptr.vmem [resolvable:$true] %s35_s25 }
   0x6   :  { %38 = dma.hbm_to_vmem [thread:$0]  %s34_s23, 128, %s36_s25, [#allocation6]  }
   0x7   :  { %s56_s30 = sshll.u32 %s474_s29, 4  ;;  %s475_s7 = smov 64   ;;  %s57_s30 = int_to_ptr.vmem [resolvable:$true] %s56_s30 }
   0x8   :  { %s476_s8 = smov 4   ;;  %s22_s10 = sshll.u32 %s553_s0, 4  ;;  %s23_s10 = int_to_ptr.hbm [resolvable:$true] %s22_s10 }
   0x9   :  { %62 = dma.hbm_to_vmem [thread:$0]  %s55_s28, 256, %s57_s30, [#allocation9], %s475_s7, %s475_s7, %s476_s8  }
   0xa   :  { %s477_s11 = smov [#allocation2]   ;;  %s44_s14 = sshll.u32 %s555_s2, 4  ;;  %s45_s14 = int_to_ptr.hbm [resolvable:$true] %s44_s14 }
   0xb   :  { %s24_s12 = sshll.u32 %s477_s11, 4  ;;  %s478_s15 = smov [#allocation7]   ;;  %s25_s12 = int_to_ptr.vmem [resolvable:$true] %s24_s12 }
   0xc   :  { %27 = dma.hbm_to_vmem [thread:$0]  %s23_s10, 128, %s25_s12, [#allocation3]  }
   0xd   :  { %s46_s16 = sshll.u32 %s478_s15, 4  ;;  %s67_s19 = sshll.u32 %s557_s4, 4  ;;  %s47_s16 = int_to_ptr.vmem [resolvable:$true] %s46_s16  ;;  %s68_s19 = int_to_ptr.hbm [resolvable:$true] %s67_s19 }
   0xe   :  { %49 = dma.hbm_to_vmem [thread:$0]  %s45_s14, 128, %s47_s16, [#allocation6]  }
   0xf   :  { %s479_s0 = smov [#allocation10]  }
  0x10   :  { %s69_s20 = sshll.u32 %s479_s0, 4  ;;  %s70_s20 = int_to_ptr.vmem [resolvable:$true] %s69_s20 }
  0x11   :  { %75 = dma.hbm_to_vmem [thread:$0]  %s68_s19, 256, %s70_s20, [#allocation9], %s475_s7, %s475_s7, %s476_s8  }
  0x12   :  { %463 = dma.done.wait [#allocation3], 128  }
  0x13   :  { %464 = vsyncadd [#allocation3], 4294967168 }
  0x14   :  { %465 = dma.done.wait [#allocation6], 256  }
  0x15   :  { %466 = vsyncadd [#allocation6], 4294967040 }
  0x16   :  { %467 = dma.done.wait [#allocation9], 512  }
  0x17   :  { %468 = vsyncadd [#allocation9], 4294966784  ;;  %v275_v0 = vld [vmem:[#allocation10 + $0x8] sm:$0xff]  ;;  %v273_v1 = vld [vmem:[#allocation8 + $0x8] sm:$0xff]  ;;  %vm121_vm0 = vcmask 261120   ;;  %s480_s2 = smov 32  }
  0x18   :  { %v274_v2 = vld [vmem:[#allocation10] sm:$0xff]  ;;  %131 = vmatpush.bf16.msra.mxu0 %v275_v0  ;;  %159 = vmatpush.bf16.msra.mxu1 %v273_v1  ;;  %v272_v3 = vld [vmem:[#allocation8] sm:$0xff]  ;;  %v97_v5 = vld [vmem:[#allocation2] sm:$0xff]  ;;  %s481_s4 = smov 96   ;;  %s482_s21 = smov [#allocation11]  }
  0x19   :  { %v103_v4 = vld [vmem:[#allocation5] sm:$0xff]  ;;  %v98_v7 = vpack.c.bf16 %v97_v5, %v97_v5  ;;  %v166_v14 = vld [vmem:[#allocation7] sm:$0xff]  ;;  %s223_s22 = sshll.u32 %s482_s21, 4  ;;  %s225_s25 = sshll.u32 %s558_s5, 4  ;;  %s224_s22 = int_to_ptr.vmem [resolvable:$true] %s223_s22  ;;  %s226_s25 = int_to_ptr.hbm [resolvable:$true] %s225_s25 }
  0x1a   :  { %v104_v6 = vpack.c.bf16 %v103_v4, %v103_v4  ;;  %s483_s26 = smov [#allocation12]   ;;  %s236_s30 = sshll.u32 %s559_s6, 4  ;;  %s237_s30 = int_to_ptr.hbm [resolvable:$true] %s236_s30 }
  0x1b   :  { %s234_s27 = sshll.u32 %s483_s26, 4  ;;  %s235_s27 = int_to_ptr.vmem [resolvable:$true] %s234_s27 }
  0x1c   :  { %132 = vmatpush.bf16.msra.mxu0 %v274_v2  ;;  %160 = vmatpush.bf16.msra.mxu1 %v272_v3 }
  0x1f   :  { %261 = vmatmul.msk.bf16.vlgmr.msra.gmra.mxu0 %vm121_vm0, %v104_v6  ;;  %270 = vmatmul.msk.bf16.vlgmr.msra.gmra.mxu1 %vm121_vm0, %v98_v7 }
  0x9c   :  { %v134_v8 = vpop.f32.mrf.mxu0  ;;  %v162_v9 = vpop.f32.mrf.mxu1 }
  0x9d   :  { %v163_v10 = vadd.f32 %v162_v9, %v134_v8 }
  0x9f   :  { %287 = vtanh.f32 %v163_v10  ;;  %v271_v15 = vmul.f32 -1.442695, %v163_v10 }
  0xa1   :  { %289 = vpow2.f32 %v271_v15 }
  0xa4   :  { %v136_v11 = vpop.f32.mrf.mxu0  ;;  %v164_v12 = vpop.f32.mrf.mxu1 }
  0xa5   :  { %v288_v13 = vpop.eup %287 }
  0xa6   :  { %193 = vrot.lane.b32.xlu0 %v288_v13, %s475_s7 }
  0xa7   :  { %v290_v16 = vpop.eup %289 }
  0xa8   :  { %v170_v17 = vadd.f32 1.0, %v290_v16 }
  0xaa   :  { %291 = vrcp.f32 %v170_v17  ;;  %v182_v23 = vand.u32 2147483648, %v170_v17  ;;  %vm176_vm2 = vweird.f32 %v170_v17  ;;  %v180_v24 = vand.u32 2147483647, %v170_v17 }
  0xac   :  { %v183_v26 = vor.u32 1.1754944e-38, %v182_v23  ;;  %vm181_vm4 = vcmp.eq.f32.partialorder %v180_v24, 8.507059e+37 }
  0xae   :  { %188 = vrot.lane.b32.xlu0 %v166_v14, %s480_s2 }
  0xb0   :  { %v292_v18 = vpop.eup %291 }
  0xb1   :  { %v172_v19 = vmul.f32 %v292_v18, %v170_v17  ;;  %vm177_vm1 = vweird.f32 %v292_v18 }
  0xb2   :  { %vm178_vm3 = vmor %vm176_vm2, %vm177_vm1 }
  0xb3   :  { %v173_v20 = vsub.f32 1.0, %v172_v19 }
  0xb5   :  { %v174_v21 = vmul.f32 %v292_v18, %v173_v20 }
  0xb7   :  { %v175_v22 = vadd.f32 %v292_v18, %v174_v21 }
  0xb9   :  { %v179_v25 = vsel %vm178_vm3, %v292_v18, %v175_v22 }
  0xba   :  { %v184_v28 = vsel %vm181_vm4, %v183_v26, %v179_v25 }
 0x118   :  { %v194_v27 = vpop.permute.xlu0 %193 }
 0x119   :  { %v196_v29 = vmul.f32 %v194_v27, %v184_v28 }
 0x11b   :  { %198 = vrot.lane.b32.xlu1 %v196_v29, %s480_s2 }
 0x120   :  { %v189_v30 = vpop.permute.xlu0 %188 }
 0x121   :  { %v191_v31 = vmul.f32 %v189_v30, %v184_v28 }
 0x18d   :  { %v199_v32 = vpop.permute.xlu1 %198 }
 0x18e   :  { %v201_v33 = vadd.f32 %v199_v32, %v191_v31 }
 0x190   :  { %293 = vtanh.f32 %v201_v33 }
 0x196   :  { %v294_v34 = vpop.eup %293 }
 0x197   :  { %204 = vrot.lane.b32.xlu1 %v294_v34, %s475_s7 }
 0x209   :  { %v205_v35 = vpop.permute.xlu1 %204 }
 0x20a   :  { %v207_v36 = vmul.f32 %v205_v35, %v184_v28 }
 0x20c   :  { %209 = vrot.lane.b32.xlu2 %v207_v36, %s480_s2 }
 0x214   :  { %214 = vrot.lane.b32.xlu2 %v201_v33, %s481_s4 }
 0x266   :  { %v210_v37 = vpop.permute.xlu2 %209 }
 0x267   :  { %212 = vst.msk [vmem:[#allocation11] sm:$0xff] %vm121_vm0, %v210_v37 }
 0x268   :  { %228 = dma.vmem_to_hbm [thread:$0]  %s224_s22, 128, %s226_s25, [#allocation4]  }
 0x26e   :  { %v215_v38 = vpop.permute.xlu2 %214 }
 0x26f   :  { %217 = vst.msk [vmem:[#allocation12] sm:$0xff] %vm121_vm0, %v215_v38 }
 0x270   :  { %239 = dma.vmem_to_hbm [thread:$0]  %s235_s27, 128, %s237_s30, [#allocation13]  }
 0x271   :  { %469 = dma.done.wait [#allocation4], 128  }
 0x272   :  { %470 = vsyncadd [#allocation4], 4294967168 }
 0x273   :  { %471 = dma.done.wait [#allocation13], 128  }
 0x274   :  { %472 = vsyncadd [#allocation13], 4294967168 }
 0x275   :  { %248 = vsyncpa [#allocation3], 1 }
 0x276   :  { %249 = vsyncpa [#allocation6], 1 }
 0x277   :  { %250 = vsyncpa [#allocation9], 1 }
 0x278   :  { %251 = vsyncpa [#allocation4], 1 }
 0x279   :  { %252 = vsyncpa [#allocation13], 1 }

</bundles_post_ra>
